<compile_context>
chip_gen: v5e
topology: v5e:2x2
jax: 0.10.0
libtpu: 0.0.40
codegen_flags: <defaults>
</compile_context>

<pallas_src>
import functools

import jax
import jax.numpy as jnp
from jax.experimental import pallas as pl
from jax.experimental.pallas import tpu as pltpu

MIN_LOG_STD = -6.0
MAX_LOG_STD = 0.0


def _actor_mlp_kernel(state_ref, w0_ref, b0_ref, w1_ref, b1_ref, w2_ref, b2_ref,
                      out_ref):
    """One grid step = (meta_model m, batch tile t).

    state_ref : (TB, obs_dim)      bf16
    w*_ref    : (in_dim, out_dim)  bf16  (weights of meta model m; leading
                                          size-1 dim squeezed by BlockSpec)
    b0/b1_ref : (1, H)             f32 on v5e, bf16 on v6e/v7x (elementwise dtype)
    b2_ref    : (1, two_act)       f32
    out_ref   : (TB, two_act)      f32   (unpadded mu|log_std; clamp in wrapper)
    """
    x = state_ref[...]                                   # bf16 (TB, obs_dim)
    ew = b0_ref.dtype                                    # elementwise dtype

    h = jnp.dot(x, w0_ref[...], preferred_element_type=jnp.float32)
    h = jnp.maximum(h.astype(ew) + b0_ref[...], 0.0).astype(jnp.bfloat16)

    h = jnp.dot(h, w1_ref[...], preferred_element_type=jnp.float32)
    h = jnp.maximum(h.astype(ew) + b1_ref[...], 0.0).astype(jnp.bfloat16)

    out_ref[...] = (jnp.dot(h, w2_ref[...], preferred_element_type=jnp.float32)
                    + b2_ref[...])


def _default_elementwise_bf16():
    """bf16 bias-add/ReLU only on chips with a bf16 VPU (v6e/v7x)."""
    try:
        kind = jax.devices()[0].device_kind.lower()
    except Exception:
        return False
    if "tpu" not in kind:
        return False
    for old in ("v2", "v3", "v4", "v5"):
        if old in kind:
            return False
    return True


@functools.partial(jax.jit,
                   static_argnames=("meta_batch_size", "tile_b",
                                    "elementwise_bf16"))
def hyper_actor_forward(state, w0, b0, w1, b1, w2, b2, *, meta_batch_size,
                        tile_b=None, elementwise_bf16=False):
    """Returns (mu, log_std), each (B, act_dim) f32."""
    B, obs_dim = state.shape
    M = meta_batch_size
    assert B % M == 0, "batch must be divisible by meta_batch_size"
    batch_per_net = B // M

    H0 = w0.shape[-1]
    H1 = w1.shape[-1]
    two_act = w2.shape[-1]
    act_dim = two_act // 2

    # ---- batch-tile selection -------------------------------------------
    if tile_b is None:
        cap = 8192                      # ~5 MiB VMEM at this size (see budget)
        if batch_per_net <= cap:
            tile_b = batch_per_net
        else:
            tile_b = None
            for cand in range(cap, 7, -8):          # multiples of 8, descending
                if batch_per_net % cand == 0:
                    tile_b = cand
                    break
            if tile_b is None:
                tile_b = batch_per_net              # fall back: one tile/net
        # v7x megacore: guarantee >= 2 grid steps so neither TensorCore idles.
        if (M * (batch_per_net // tile_b) < 2 and tile_b >= 16
                and tile_b % 16 == 0):
            tile_b //= 2
    assert batch_per_net % tile_b == 0, "batch_per_net must be divisible by tile_b"
    assert tile_b == B or tile_b % 8 == 0, (
        "tile_b must be a multiple of 8 (sublane constraint) unless it spans "
        "the full batch")
    tiles_per_net = batch_per_net // tile_b

    # ---- dtypes: bf16 MXU operands, f32 accumulation ---------------------
    ew_dtype = jnp.bfloat16 if elementwise_bf16 else jnp.float32
    ew_bytes = 2 if elementwise_bf16 else 4
    state_bf = state.astype(jnp.bfloat16)
    w0_bf = w0.astype(jnp.bfloat16)
    w1_bf = w1.astype(jnp.bfloat16)
    w2_bf = w2.astype(jnp.bfloat16)
    b0_e = b0.astype(ew_dtype)
    b1_e = b1.astype(ew_dtype)
    b2_f = b2.astype(jnp.float32)                 # final layer stays f32

    grid = (M, tiles_per_net)

    def state_map(m, t):
        return (m * tiles_per_net + t, 0)

    def per_model(m, t):
        # Weights depend only on m -> stay VMEM-resident across inner t axis.
        return (m, 0, 0)

    # ---- advisory cost estimate (unpadded output) -------------------------
    flops = 2 * B * (obs_dim * H0 + H0 * H1 + H1 * two_act)
    bytes_accessed = (
        state_bf.size * 2
        + (w0_bf.size + w1_bf.size + w2_bf.size) * 2
        + (b0_e.size + b1_e.size) * ew_bytes
        + b2_f.size * 4
        + B * two_act * 4)
    cost = pl.CostEstimate(flops=flops, transcendentals=0,
                           bytes_accessed=bytes_accessed)

    # ---- VMEM budget -------------------------------------------------------
    # Double-buffered state/output tiles + double-buffered per-model weights
    # + compiler-managed scratch for the spilled (tile_b, H) intermediates
    # (they exceed the 64-vreg file at tile_b >= 512 and live in VMEM).
    # Capped at 32 MiB: safe on v5e/v6e (128 MiB physical) and v7x (64 MiB).
    vmem_est = (
        2 * tile_b * obs_dim * 2                              # bf16 state tile
        + 2 * tile_b * two_act * 4                            # f32 output tile
        + 2 * ((obs_dim * H0 + H0 * H1 + H1 * two_act) * 2    # bf16 weights
               + (H0 + H1) * ew_bytes + two_act * 4)          # biases
        + 2 * tile_b * max(H0, H1) * 4)                       # intermediates
    vmem_limit = int(min(max(2 * vmem_est, 16 * 1024 * 1024),
                         32 * 1024 * 1024))

    out = pl.pallas_call(
        _actor_mlp_kernel,
        out_shape=jax.ShapeDtypeStruct((B, two_act), jnp.float32),
        grid_spec=pltpu.PrefetchScalarGridSpec(
            num_scalar_prefetch=0,
            grid=grid,
            in_specs=[
                pl.BlockSpec((tile_b, obs_dim), state_map),
                pl.BlockSpec((pl.Squeezed(), obs_dim, H0), per_model),
                pl.BlockSpec((pl.Squeezed(), 1, H0), per_model),
                pl.BlockSpec((pl.Squeezed(), H0, H1), per_model),
                pl.BlockSpec((pl.Squeezed(), 1, H1), per_model),
                pl.BlockSpec((pl.Squeezed(), H1, two_act), per_model),
                pl.BlockSpec((pl.Squeezed(), 1, two_act), per_model),
            ],
            out_specs=pl.BlockSpec((tile_b, two_act), state_map),
        ),
        compiler_params=pltpu.CompilerParams(
            dimension_semantics=("parallel", "parallel"),
            vmem_limit_bytes=vmem_limit),
        cost_estimate=cost,
    )(state_bf, w0_bf, b0_e, w1_bf, b1_e, w2_bf, b2_f)

    # Split / clamp in the wrapper (free layout plumbing, fused by XLA).
    mu = out[:, :act_dim]
    log_std = jnp.clip(out[:, act_dim:], MIN_LOG_STD, MAX_LOG_STD)
    return mu, log_std


def _reference_forward(state, w0, b0, w1, b1, w2, b2, meta_batch_size,
                       elementwise_bf16=False):
    """Pure-JAX reference matching the PyTorch forward with the same numerics
    as the kernel (bf16 matmul operands, f32 accumulation, elementwise dtype
    matching the kernel's chip-dependent choice)."""
    ew = jnp.bfloat16 if elementwise_bf16 else jnp.float32
    B = state.shape[0]
    bpn = B // meta_batch_size
    outs = []
    for m in range(meta_batch_size):
        x = state[m * bpn:(m + 1) * bpn].astype(jnp.bfloat16)
        h = jnp.dot(x, w0[m].astype(jnp.bfloat16),
                    preferred_element_type=jnp.float32)
        h = jnp.maximum(h.astype(ew) + b0[m, 0].astype(ew),
                        0.0).astype(jnp.bfloat16)
        h = jnp.dot(h, w1[m].astype(jnp.bfloat16),
                    preferred_element_type=jnp.float32)
        h = jnp.maximum(h.astype(ew) + b1[m, 0].astype(ew),
                        0.0).astype(jnp.bfloat16)
        outs.append(jnp.dot(h, w2[m].astype(jnp.bfloat16),
                            preferred_element_type=jnp.float32)
                    + b2[m, 0].astype(jnp.float32))
    x = jnp.concatenate(outs, axis=0)
    act_dim = x.shape[-1] // 2
    mu = x[:, :act_dim]
    log_std = jnp.clip(x[:, act_dim:], MIN_LOG_STD, MAX_LOG_STD)
    return mu, log_std


if __name__ == "__main__":
    # Small shapes consistent with the module's forward.
    obs_dim = 16
    act_dim = 4
    meta_batch_size = 2
    batch_per_net = 256                  # batch tiles amortize grid overhead
    B = meta_batch_size * batch_per_net  # total batch = 512
    arc = (32, 32)                       # one fixed sampled architecture

    key = jax.random.PRNGKey(0)
    ks = jax.random.split(key, 8)

    def init_w(k, shape, fan_in):
        bound = 1.0 / jnp.sqrt(jnp.float32(fan_in))
        return jax.random.uniform(k, shape, jnp.float32, -bound, bound)

    M = meta_batch_size
    H0, H1 = arc
    two_act = 2 * act_dim

    state = jax.random.normal(ks[0], (B, obs_dim), dtype=jnp.float32)
    w0 = init_w(ks[1], (M, obs_dim, H0), obs_dim)
    b0 = init_w(ks[2], (M, 1, H0), obs_dim)
    w1 = init_w(ks[3], (M, H0, H1), H0)
    b1 = init_w(ks[4], (M, 1, H1), H0)
    w2 = init_w(ks[5], (M, H1, two_act), H1)
    b2 = init_w(ks[6], (M, 1, two_act), H1)

    ew_bf16 = _default_elementwise_bf16()

    mu, log_std = hyper_actor_forward(
        state, w0, b0, w1, b1, w2, b2, meta_batch_size=meta_batch_size,
        elementwise_bf16=ew_bf16)
    jax.block_until_ready((mu, log_std))

    mu_ref, log_std_ref = _reference_forward(
        state, w0, b0, w1, b1, w2, b2, meta_batch_size,
        elementwise_bf16=ew_bf16)

    assert mu.shape == (B, act_dim) and log_std.shape == (B, act_dim)
    # bf16 matmul operands with f32 accumulation -> loosened tolerance.
    assert jnp.allclose(mu, mu_ref, atol=2e-2, rtol=2e-2)
    assert jnp.allclose(log_std, log_std_ref, atol=2e-2, rtol=2e-2)

    print("KERNEL_OK")
</pallas_src>

<mosaic_0001>
module attributes {stable_mosaic.version = 11 : i64} {
  func.func @_actor_mlp_kernel(%arg0: i32, %arg1: i32, %arg2: memref<256x16xbf16, #tpu.memory_space<vmem>>, %arg3: memref<1x16x32xbf16, #tpu.memory_space<vmem>>, %arg4: memref<1x1x32xf32, #tpu.memory_space<vmem>>, %arg5: memref<1x32x32xbf16, #tpu.memory_space<vmem>>, %arg6: memref<1x1x32xf32, #tpu.memory_space<vmem>>, %arg7: memref<1x32x8xbf16, #tpu.memory_space<vmem>>, %arg8: memref<1x1x8xf32, #tpu.memory_space<vmem>>, %arg9: memref<256x8xf32, #tpu.memory_space<vmem>>) attributes {dimension_semantics = [#tpu.dimension_semantics<parallel>, #tpu.dimension_semantics<parallel>], iteration_bounds = array<i64: 2, 1>, scalar_prefetch = 0 : i64, scratch_operands = 0 : i64, tpu.core_type = #tpu.core_type<tc>, window_params = [{transform_indices = @transform_0, window_bounds = array<i64: 256, 16>}, {transform_indices = @transform_1, window_bounds = array<i64: 1, 16, 32>}, {transform_indices = @transform_2, window_bounds = array<i64: 1, 1, 32>}, {transform_indices = @transform_3, window_bounds = array<i64: 1, 32, 32>}, {transform_indices = @transform_4, window_bounds = array<i64: 1, 1, 32>}, {transform_indices = @transform_5, window_bounds = array<i64: 1, 32, 8>}, {transform_indices = @transform_6, window_bounds = array<i64: 1, 1, 8>}, {transform_indices = @transform_7, window_bounds = array<i64: 256, 8>}]} {
    %c0 = arith.constant 0 : index
    %c0_0 = arith.constant 0 : index
    %0 = vector.load %arg2[%c0, %c0_0] : memref<256x16xbf16, #tpu.memory_space<vmem>>, vector<256x16xbf16>
    %c0_1 = arith.constant 0 : index
    %c0_2 = arith.constant 0 : index
    %c0_3 = arith.constant 0 : index
    %1 = vector.load %arg3[%c0_1, %c0_2, %c0_3] : memref<1x16x32xbf16, #tpu.memory_space<vmem>>, vector<1x16x32xbf16>
    %2 = vector.shape_cast %1 : vector<1x16x32xbf16> to vector<16x32xbf16>
    %cst = arith.constant dense<0.000000e+00> : vector<256x32xf32>
    %3 = tpu.matmul %0, %2, %cst {dimension_numbers = #tpu.dot_dimension_numbers<[1], [0], [0], [1], [0, 0, 1, 1], [], []>} : vector<256x16xbf16>, vector<16x32xbf16>, vector<256x32xf32> -> vector<256x32xf32>
    %c0_4 = arith.constant 0 : index
    %c0_5 = arith.constant 0 : index
    %c0_6 = arith.constant 0 : index
    %4 = vector.load %arg4[%c0_4, %c0_5, %c0_6] : memref<1x1x32xf32, #tpu.memory_space<vmem>>, vector<1x1x32xf32>
    %5 = vector.shape_cast %4 : vector<1x1x32xf32> to vector<1x32xf32>
    %6 = vector.broadcast %5 : vector<1x32xf32> to vector<256x32xf32>
    %7 = arith.addf %3, %6 : vector<256x32xf32>
    %cst_7 = arith.constant 0.000000e+00 : f32
    %8 = vector.broadcast %cst_7 : f32 to vector<256x32xf32>
    %9 = arith.maximumf %7, %8 : vector<256x32xf32>
    %10 = arith.truncf %9 : vector<256x32xf32> to vector<256x32xbf16>
    %c0_8 = arith.constant 0 : index
    %c0_9 = arith.constant 0 : index
    %c0_10 = arith.constant 0 : index
    %11 = vector.load %arg5[%c0_8, %c0_9, %c0_10] : memref<1x32x32xbf16, #tpu.memory_space<vmem>>, vector<1x32x32xbf16>
    %12 = vector.shape_cast %11 : vector<1x32x32xbf16> to vector<32x32xbf16>
    %cst_11 = arith.constant dense<0.000000e+00> : vector<256x32xf32>
    %13 = tpu.matmul %10, %12, %cst_11 {dimension_numbers = #tpu.dot_dimension_numbers<[1], [0], [0], [1], [0, 0, 1, 1], [], []>} : vector<256x32xbf16>, vector<32x32xbf16>, vector<256x32xf32> -> vector<256x32xf32>
    %c0_12 = arith.constant 0 : index
    %c0_13 = arith.constant 0 : index
    %c0_14 = arith.constant 0 : index
    %14 = vector.load %arg6[%c0_12, %c0_13, %c0_14] : memref<1x1x32xf32, #tpu.memory_space<vmem>>, vector<1x1x32xf32>
    %15 = vector.shape_cast %14 : vector<1x1x32xf32> to vector<1x32xf32>
    %16 = vector.broadcast %15 : vector<1x32xf32> to vector<256x32xf32>
    %17 = arith.addf %13, %16 : vector<256x32xf32>
    %cst_15 = arith.constant 0.000000e+00 : f32
    %18 = vector.broadcast %cst_15 : f32 to vector<256x32xf32>
    %19 = arith.maximumf %17, %18 : vector<256x32xf32>
    %20 = arith.truncf %19 : vector<256x32xf32> to vector<256x32xbf16>
    %c0_16 = arith.constant 0 : index
    %c0_17 = arith.constant 0 : index
    %c0_18 = arith.constant 0 : index
    %21 = vector.load %arg7[%c0_16, %c0_17, %c0_18] : memref<1x32x8xbf16, #tpu.memory_space<vmem>>, vector<1x32x8xbf16>
    %22 = vector.shape_cast %21 : vector<1x32x8xbf16> to vector<32x8xbf16>
    %cst_19 = arith.constant dense<0.000000e+00> : vector<256x8xf32>
    %23 = tpu.matmul %20, %22, %cst_19 {dimension_numbers = #tpu.dot_dimension_numbers<[1], [0], [0], [1], [0, 0, 1, 1], [], []>} : vector<256x32xbf16>, vector<32x8xbf16>, vector<256x8xf32> -> vector<256x8xf32>
    %c0_20 = arith.constant 0 : index
    %c0_21 = arith.constant 0 : index
    %c0_22 = arith.constant 0 : index
    %24 = vector.load %arg8[%c0_20, %c0_21, %c0_22] : memref<1x1x8xf32, #tpu.memory_space<vmem>>, vector<1x1x8xf32>
    %25 = vector.shape_cast %24 : vector<1x1x8xf32> to vector<1x8xf32>
    %26 = vector.broadcast %25 : vector<1x8xf32> to vector<256x8xf32>
    %27 = arith.addf %23, %26 : vector<256x8xf32>
    %c0_23 = arith.constant 0 : index
    %c0_24 = arith.constant 0 : index
    %28 = vector.load %arg9[%c0_23, %c0_24] : memref<256x8xf32, #tpu.memory_space<vmem>>, vector<256x8xf32>
    tpu.vector_store %arg9[%c0_23, %c0_24], %27 {strides = array<i32>} : memref<256x8xf32, #tpu.memory_space<vmem>>, vector<256x8xf32>,
    return
  }
  func.func @transform_0(%arg0: i32, %arg1: i32) -> (i32, i32) {
    %c1_i32 = arith.constant 1 : i32
    %0 = arith.muli %arg0, %c1_i32 : i32
    %1 = arith.addi %0, %arg1 : i32
    %c0_i32 = arith.constant 0 : i32
    %c0_i32_0 = arith.constant 0 : i32
    return %1, %c0_i32 : i32, i32
  }
  func.func @transform_1(%arg0: i32, %arg1: i32) -> (i32, i32, i32) {
    %c0_i32 = arith.constant 0 : i32
    %c0_i32_0 = arith.constant 0 : i32
    %c0_i32_1 = arith.constant 0 : i32
    return %arg0, %c0_i32, %c0_i32_0 : i32, i32, i32
  }
  func.func @transform_2(%arg0: i32, %arg1: i32) -> (i32, i32, i32) {
    %c0_i32 = arith.constant 0 : i32
    %c0_i32_0 = arith.constant 0 : i32
    %c0_i32_1 = arith.constant 0 : i32
    return %arg0, %c0_i32, %c0_i32_0 : i32, i32, i32
  }
  func.func @transform_3(%arg0: i32, %arg1: i32) -> (i32, i32, i32) {
    %c0_i32 = arith.constant 0 : i32
    %c0_i32_0 = arith.constant 0 : i32
    %c0_i32_1 = arith.constant 0 : i32
    return %arg0, %c0_i32, %c0_i32_0 : i32, i32, i32
  }
  func.func @transform_4(%arg0: i32, %arg1: i32) -> (i32, i32, i32) {
    %c0_i32 = arith.constant 0 : i32
    %c0_i32_0 = arith.constant 0 : i32
    %c0_i32_1 = arith.constant 0 : i32
    return %arg0, %c0_i32, %c0_i32_0 : i32, i32, i32
  }
  func.func @transform_5(%arg0: i32, %arg1: i32) -> (i32, i32, i32) {
    %c0_i32 = arith.constant 0 : i32
    %c0_i32_0 = arith.constant 0 : i32
    %c0_i32_1 = arith.constant 0 : i32
    return %arg0, %c0_i32, %c0_i32_0 : i32, i32, i32
  }
  func.func @transform_6(%arg0: i32, %arg1: i32) -> (i32, i32, i32) {
    %c0_i32 = arith.constant 0 : i32
    %c0_i32_0 = arith.constant 0 : i32
    %c0_i32_1 = arith.constant 0 : i32
    return %arg0, %c0_i32, %c0_i32_0 : i32, i32, i32
  }
  func.func @transform_7(%arg0: i32, %arg1: i32) -> (i32, i32) {
    %c1_i32 = arith.constant 1 : i32
    %0 = arith.muli %arg0, %c1_i32 : i32
    %1 = arith.addi %0, %arg1 : i32
    %c0_i32 = arith.constant 0 : i32
    %c0_i32_0 = arith.constant 0 : i32
    return %1, %c0_i32 : i32, i32
  }
}

</mosaic_0001>

<bundles_post_ra>
// kernel: hyper_actor_forward.1
= control target key start
LH: loop header
LB: loop body
LE: loop exit
PB: predicated region body
PF: predicated region fallthrough
CT: control target
= control target key end

     0   :  { %s1515_s24 = smov 0   ;;  %s1517_s25 = smov 0   ;;  %s1830_s0 = inlined_call_operand.vmem [shape: bf16[512,16], index: 0, kind: input, shape index: {}]   ;;  %s1831_s1 = inlined_call_operand.vmem [shape: bf16[2,16,32], index: 1, kind: input, shape index: {}]   ;;  %s1832_s2 = inlined_call_operand.vmem [shape: f32[2,1,32], index: 2, kind: input, shape index: {}]   ;;  %s1833_s3 = inlined_call_operand.vmem [shape: bf16[2,32,32], index: 3, kind: input, shape index: {}]   ;;  %s1834_s4 = inlined_call_operand.vmem [shape: f32[2,1,32], index: 4, kind: input, shape index: {}]   ;;  %s1835_s5 = inlined_call_operand.vmem [shape: bf16[2,32,8], index: 5, kind: input, shape index: {}]   ;;  %s1836_s6 = inlined_call_operand.vmem [shape: f32[2,1,8], index: 6, kind: input, shape index: {}]   ;;  %s1837_s7 = inlined_call_operand.vmem [shape: f32[512,8], index: 7, kind: output, shape index: {}]  }
   0x1   :  { %s1519_s26 = smov 0  }
   0x2 LB: > { %s29_s27 = sadd.s32 1, %s1469_s25  ;;  %p1250_p0 = scmp.ge.s32.totalorder %s1473_s26, 1  ;;  %s1473_s26 = sphi %s1519_s26, %s17_s26   ;;  %s1469_s25 = sphi %s1517_s25, %s1839_s25   ;;  %s1465_s24 = sphi %s1515_s24, %s1838_s24  }
   0x3   : > { %p31_p1 = scmp.ge.s32.totalorder %s29_s27, 2  ;;  %p310_p2 = scmp.lt.s32.totalorder %s1473_s26, 3 }
   0x5   : > { %s1841_s27 = smov (%p31_p1, %s29_s27), 0  ;;  %p311_p3 = pnand %p1250_p0, %p310_p2 }
   0x6   : > { %p376_p4 = scmp.lt.s32.totalorder (!%p311_p3), %s1465_s24, 1  ;;  %s1251_s28 = sshll.u32 (!%p311_p3), %s1465_s24, 5 }
   0x7   : > { %314 = sbr.rel (%p311_p3) target bundleno = 688 (0x2b0), region = 48  ;;  %p370_p5 = scmp.lt.s32.totalorder (!%p311_p3), %s1251_s28, 63 }
   0xc   : > { %s1843_s24 = smov (!%p376_p4, %s1465_s24), 1  ;;  %s1845_s28 = smov (!%p370_p5, %s1251_s28), 63  ;;  %vm533_vm0 = vcmask 130048   ;;  %vm739_vm1 = vcmask 261120   ;;  %vm1082_vm2 = vcmask 64512  }
   0xd   : > { %s1395_s29 = sshll.u32 %s1843_s24, 3  ;;  %s383_s9 = scalar_lea.vmem %s1832_s2, %s1843_s24 }
   0xe   : > { %s380_s12 = scalar_lea.vmem %s1831_s1, %s1395_s29  ;;  %s1252_s13 = sshll.u32 %s1845_s28, 2  ;;  %v1579_v13 = vld [vmem:[%s383_s9] ss:$0 sm:$0xff] }
   0xf   : > { %v1414_v0 = vld [vmem:[%s380_s12] sm:$0xff]  ;;  %s1549_s16 = scalar_lea.vmem %s1830_s0, %s1252_s13  ;;  %s1396_s17 = sshll.u32 %s1843_s24, 4 }
  0x10   : > { %v1398_v1 = vld [vmem:[%s1549_s16] sm:$0xff]  ;;  %589 = vmatpush.bf16.msra.mxu0 %v1414_v0  ;;  %1419 = vmatpush.bf16.msra.mxu3 %v1414_v0  ;;  %v1399_v2 = vld [vmem:[%s1549_s16 + $0x8] sm:$0xff]  ;;  %v1400_v3 = vld [vmem:[%s1549_s16 + $0x10] sm:$0xff]  ;;  %s388_s20 = scalar_lea.vmem %s1833_s3, %s1396_s17  ;;  %s391_s30 = scalar_lea.vmem %s1834_s4, %s1843_s24 }
  0x11   : > { %v1401_v4 = vld [vmem:[%s1549_s16 + $0x18] sm:$0xff]  ;;  %v1402_v5 = vld [vmem:[%s1549_s16 + $0x20] sm:$0xff]  ;;  %v1403_v6 = vld [vmem:[%s1549_s16 + $0x28] sm:$0xff]  ;;  %s396_s10 = scalar_lea.vmem %s1835_s5, %s1396_s17  ;;  %s399_s15 = scalar_lea.vmem %s1836_s6, %s1843_s24 }
  0x12   : > { %v1404_v7 = vld [vmem:[%s1549_s16 + $0x30] sm:$0xff]  ;;  %v1416_v8 = vld [vmem:[%s388_s20 + $0x8] sm:$0xff]  ;;  %v1415_v9 = vld [vmem:[%s388_s20] sm:$0xff] }
  0x13   : > { %1329 = vmatmul.msk.bf16.vlgmr.msra.gmra.mxu0 %vm533_vm0, %v1398_v1  ;;  %794 = vmatpush.bf16.msra.mxu1 %v1416_v8  ;;  %v1405_v10 = vld [vmem:[%s1549_s16 + $0x38] sm:$0xff]  ;;  %v1406_v11 = vld [vmem:[%s1549_s16 + $0x40] sm:$0xff]  ;;  %v1407_v20 = vld [vmem:[%s1549_s16 + $0x48] sm:$0xff] }
  0x14   : > { %1420 = vmatpush.bf16.msrb.mxu3 %v1416_v8  ;;  %v1408_v28 = vld [vmem:[%s1549_s16 + $0x50] sm:$0xff]  ;;  %v1411_v30 = vld [vmem:[%s1549_s16 + $0x68] sm:$0xff]  ;;  %v1409_v37 = vld [vmem:[%s1549_s16 + $0x58] sm:$0xff] }
  0x15   : > { %1342 = vmatmul.msk.bf16.vlgmr.msra.gmra.mxu3 %vm533_vm0, %v1411_v30  ;;  %v1412_v39 = vld [vmem:[%s1549_s16 + $0x70] sm:$0xff]  ;;  %v1410_v46 = vld [vmem:[%s1549_s16 + $0x60] sm:$0xff]  ;;  %v1413_v48 = vld [vmem:[%s1549_s16 + $0x78] sm:$0xff]  ;;  %s1260_s16 = sshll.u32 %s1845_s28, 3 }
  0x16   : > { %s1702_s21 = scalar_lea.vmem %s1837_s7, %s1260_s16 }
  0x17   : > { %795 = vmatpush.bf16.msra.mxu1 %v1415_v9 }
  0x18   : > { %1421 = vmatpush.bf16.msrb.mxu3 %v1415_v9 }
  0x23   : > { %1330 = vmatmul.msk.bf16.gmra.mxu0 %vm533_vm0, %v1399_v2 }
  0x25   : > { %1343 = vmatmul.msk.bf16.gmra.mxu3 %vm533_vm0, %v1412_v39 }
  0x33   : > { %1331 = vmatmul.msk.bf16.gmra.mxu0 %vm533_vm0, %v1400_v3 }
  0x35   : > { %1344 = vmatmul.msk.bf16.gmra.mxu3 %vm533_vm0, %v1413_v48 }
  0x43   : > { %1332 = vmatmul.msk.bf16.gmra.mxu0 %vm533_vm0, %v1401_v4 }
  0x53   : > { %1333 = vmatmul.msk.bf16.gmra.mxu0 %vm533_vm0, %v1402_v5 }
  0x63   : > { %1334 = vmatmul.msk.bf16.gmra.mxu0 %vm533_vm0, %v1403_v6  ;;  %v1418_v6 = vld [vmem:[%s396_s10 + $0x8] sm:$0xff] }
  0x64   : > { %999 = vmatpush.bf16.msra.mxu2 %v1418_v6  ;;  %1422 = vmatpush.bf16.msra.mxu3 %v1418_v6 }
  0x73   : > { %1335 = vmatmul.msk.bf16.gmra.mxu0 %vm533_vm0, %v1404_v7  ;;  %v1417_v7 = vld [vmem:[%s396_s10] sm:$0xff] }
  0x74   : > { %1000 = vmatpush.bf16.msra.mxu2 %v1417_v7  ;;  %1423 = vmatpush.bf16.msra.mxu3 %v1417_v7 }
  0x83   : > { %1336 = vmatmul.msk.bf16.gmra.mxu0 %vm533_vm0, %v1405_v10 }
  0x90   : > { %v591_v12 = vpop.f32.mrf.mxu0 }
  0x91   : > { %v592_v14 = vadd.f32 %v1579_v13, %v591_v12 }
  0x93   : > { %1337 = vmatmul.msk.bf16.gmra.mxu0 %vm533_vm0, %v1406_v11  ;;  %v671_v17 = vmax.f32 %v592_v14, 0.0 }
  0x98   : > { %v593_v15 = vpop.f32.mrf.mxu0 }
  0x99   : > { %v594_v16 = vadd.f32 %v1579_v13, %v593_v15 }
  0x9b   : > { %v672_v18 = vmax.f32 %v594_v16, 0.0 }
  0x9d   : > { %v703_v19 = vpack.c.bf16 %v672_v18, %v671_v17 }
  0x9f   : > { %1353 = vmatmul.msk.bf16.vlgmr.msra.gmra.mxu1 %vm739_vm1, %v703_v19 }
  0xa0   : > { %v596_v21 = vpop.f32.mrf.mxu0 }
  0xa1   : > { %v597_v22 = vadd.f32 %v1579_v13, %v596_v21 }
  0xa3   : > { %1338 = vmatmul.msk.bf16.gmra.mxu0 %vm533_vm0, %v1407_v20  ;;  %v673_v25 = vmax.f32 %v597_v22, 0.0 }
  0xa8   : > { %v598_v23 = vpop.f32.mrf.mxu0 }
  0xa9   : > { %v599_v24 = vadd.f32 %v1579_v13, %v598_v23  ;;  %v1636_v23 = vld [vmem:[%s391_s30] ss:$0 sm:$0xff] }
  0xab   : > { %v674_v26 = vmax.f32 %v599_v24, 0.0 }
  0xad   : > { %v704_v27 = vpack.c.bf16 %v674_v26, %v673_v25 }
  0xaf   : > { %1354 = vmatmul.msk.bf16.gmra.mxu1 %vm739_vm1, %v704_v27 }
  0xb0   : > { %v601_v29 = vpop.f32.mrf.mxu0 }
  0xb1   : > { %v602_v31 = vadd.f32 %v1579_v13, %v601_v29 }
  0xb3   : > { %1339 = vmatmul.msk.bf16.gmra.mxu0 %vm533_vm0, %v1408_v28  ;;  %v675_v34 = vmax.f32 %v602_v31, 0.0 }
  0xb8   : > { %v603_v32 = vpop.f32.mrf.mxu0 }
  0xb9   : > { %v604_v33 = vadd.f32 %v1579_v13, %v603_v32 }
  0xbb   : > { %v676_v35 = vmax.f32 %v604_v33, 0.0 }
  0xbd   : > { %v705_v36 = vpack.c.bf16 %v676_v35, %v675_v34 }
  0xbf   : > { %1355 = vmatmul.msk.bf16.gmra.mxu1 %vm739_vm1, %v705_v36 }
  0xc0   : > { %v606_v38 = vpop.f32.mrf.mxu0 }
  0xc1   : > { %v607_v40 = vadd.f32 %v1579_v13, %v606_v38 }
  0xc3   : > { %1340 = vmatmul.msk.bf16.gmra.mxu0 %vm533_vm0, %v1409_v37  ;;  %v677_v43 = vmax.f32 %v607_v40, 0.0 }
  0xc8   : > { %v608_v41 = vpop.f32.mrf.mxu0 }
  0xc9   : > { %v609_v42 = vadd.f32 %v1579_v13, %v608_v41 }
  0xcb   : > { %v678_v44 = vmax.f32 %v609_v42, 0.0 }
  0xcd   : > { %v706_v45 = vpack.c.bf16 %v678_v44, %v677_v43 }
  0xcf   : > { %1356 = vmatmul.msk.bf16.gmra.mxu1 %vm739_vm1, %v706_v45 }
  0xd0   : > { %v611_v47 = vpop.f32.mrf.mxu0 }
  0xd1   : > { %v612_v49 = vadd.f32 %v1579_v13, %v611_v47 }
  0xd3   : > { %1341 = vmatmul.msk.bf16.gmra.mxu0 %vm533_vm0, %v1410_v46  ;;  %v679_v52 = vmax.f32 %v612_v49, 0.0 }
  0xd8   : > { %v613_v50 = vpop.f32.mrf.mxu0 }
  0xd9   : > { %v614_v51 = vadd.f32 %v1579_v13, %v613_v50 }
  0xdb   : > { %v680_v53 = vmax.f32 %v614_v51, 0.0 }
  0xdd   : > { %v707_v54 = vpack.c.bf16 %v680_v53, %v679_v52 }
  0xdf   : > { %1357 = vmatmul.msk.bf16.gmra.mxu1 %vm739_vm1, %v707_v54 }
  0xe0   : > { %v616_v55 = vpop.f32.mrf.mxu0 }
  0xe1   : > { %v617_v56 = vadd.f32 %v1579_v13, %v616_v55 }
  0xe3   : > { %v681_v59 = vmax.f32 %v617_v56, 0.0 }
  0xe8   : > { %v618_v57 = vpop.f32.mrf.mxu0 }
  0xe9   : > { %v619_v58 = vadd.f32 %v1579_v13, %v618_v57 }
  0xeb   : > { %v682_v60 = vmax.f32 %v619_v58, 0.0 }
  0xed   : > { %v708_v61 = vpack.c.bf16 %v682_v60, %v681_v59 }
  0xef   : > { %1358 = vmatmul.msk.bf16.gmra.mxu1 %vm739_vm1, %v708_v61 }
  0xf0   : > { %v621_v62 = vpop.f32.mrf.mxu0 }
  0xf1   : > { %v622_v63 = vadd.f32 %v1579_v13, %v621_v62 }
  0xf3   : > { %v683_v2 = vmax.f32 %v622_v63, 0.0 }
  0xf8   : > { %v623_v0 = vpop.f32.mrf.mxu0 }
  0xf9   : > { %v624_v1 = vadd.f32 %v1579_v13, %v623_v0 }
  0xfb   : > { %v684_v3 = vmax.f32 %v624_v1, 0.0 }
  0xfd   : > { %v709_v4 = vpack.c.bf16 %v684_v3, %v683_v2  ;;  %v656_v3 = vpop.f32.mrf.mxu3 }
  0xff   : > { %1359 = vmatmul.msk.bf16.gmra.mxu1 %vm739_vm1, %v709_v4 }
 0x100   : > { %v626_v5 = vpop.f32.mrf.mxu0 }
 0x101   : > { %v627_v8 = vadd.f32 %v1579_v13, %v626_v5 }
 0x103   : > { %v685_v11 = vmax.f32 %v627_v8, 0.0 }
 0x108   : > { %v628_v9 = vpop.f32.mrf.mxu0 }
 0x109   : > { %v629_v10 = vadd.f32 %v1579_v13, %v628_v9 }
 0x10b   : > { %v686_v12 = vmax.f32 %v629_v10, 0.0 }
 0x10d   : > { %v710_v14 = vpack.c.bf16 %v686_v12, %v685_v11 }
 0x10f   : > { %1360 = vmatmul.msk.bf16.gmra.mxu1 %vm739_vm1, %v710_v14  ;;  %v658_v14 = vpop.f32.mrf.mxu3 }
 0x110   : > { %v631_v15 = vpop.f32.mrf.mxu0 }
 0x111   : > { %v632_v16 = vadd.f32 %v1579_v13, %v631_v15 }
 0x113   : > { %v687_v19 = vmax.f32 %v632_v16, 0.0 }
 0x118   : > { %v633_v17 = vpop.f32.mrf.mxu0 }
 0x119   : > { %v634_v18 = vadd.f32 %v1579_v13, %v633_v17 }
 0x11b   : > { %v688_v20 = vmax.f32 %v634_v18, 0.0 }
 0x11c   : > { %v797_v21 = vpop.f32.mrf.mxu1 }
 0x11d   : > { %v711_v22 = vpack.c.bf16 %v688_v20, %v687_v19  ;;  %v798_v25 = vadd.f32 %v1636_v23, %v797_v21  ;;  %v661_v21 = vpop.f32.mrf.mxu3 }
 0x11f   : > { %1361 = vmatmul.msk.bf16.gmra.mxu1 %vm739_vm1, %v711_v22  ;;  %v877_v28 = vmax.f32 %v798_v25, 0.0  ;;  %v657_v22 = vadd.f32 %v1579_v13, %v656_v3 }
 0x120   : > { %v636_v24 = vpop.f32.mrf.mxu0 }
 0x121   : > { %v637_v29 = vadd.f32 %v1579_v13, %v636_v24  ;;  %v659_v24 = vadd.f32 %v1579_v13, %v658_v14 }
 0x123   : > { %v689_v34 = vmax.f32 %v637_v29, 0.0  ;;  %v698_v29 = vmax.f32 %v659_v24, 0.0 }
 0x124   : > { %v799_v26 = vpop.f32.mrf.mxu1 }
 0x125   : > { %v800_v27 = vadd.f32 %v1636_v23, %v799_v26 }
 0x127   : > { %v878_v30 = vmax.f32 %v800_v27, 0.0 }
 0x128   : > { %v638_v31 = vpop.f32.mrf.mxu0 }
 0x129   : > { %v909_v32 = vpack.c.bf16 %v878_v30, %v877_v28  ;;  %v639_v33 = vadd.f32 %v1579_v13, %v638_v31  ;;  %v697_v28 = vmax.f32 %v657_v22, 0.0 }
 0x12b   : > { %v690_v35 = vmax.f32 %v639_v33, 0.0  ;;  %1377 = vmatmul.msk.bf16.vlgmr.msra.gmra.mxu2 %vm739_vm1, %v909_v32  ;;  %v716_v32 = vpack.c.bf16 %v698_v29, %v697_v28  ;;  %v663_v33 = vpop.f32.mrf.mxu3 }
 0x12c   : > { %v802_v36 = vpop.f32.mrf.mxu1 }
 0x12d   : > { %v712_v37 = vpack.c.bf16 %v690_v35, %v689_v34  ;;  %v803_v39 = vadd.f32 %v1636_v23, %v802_v36  ;;  %v662_v36 = vadd.f32 %v1579_v13, %v661_v21 }
 0x12f   : > { %1362 = vmatmul.msk.bf16.gmra.mxu1 %vm739_vm1, %v712_v37  ;;  %v879_v42 = vmax.f32 %v803_v39, 0.0  ;;  %v664_v37 = vadd.f32 %v1579_v13, %v663_v33 }
 0x130   : > { %v641_v38 = vpop.f32.mrf.mxu0 }
 0x131   : > { %v642_v43 = vadd.f32 %v1579_v13, %v641_v38 }
 0x133   : > { %v691_v48 = vmax.f32 %v642_v43, 0.0  ;;  %v700_v43 = vmax.f32 %v664_v37, 0.0 }
 0x134   : > { %v804_v40 = vpop.f32.mrf.mxu1 }
 0x135   : > { %v805_v41 = vadd.f32 %v1636_v23, %v804_v40 }
 0x137   : > { %v880_v44 = vmax.f32 %v805_v41, 0.0  ;;  %v666_v41 = vpop.f32.mrf.mxu3 }
 0x138   : > { %v643_v45 = vpop.f32.mrf.mxu0 }
 0x139   : > { %v910_v46 = vpack.c.bf16 %v880_v44, %v879_v42  ;;  %v644_v47 = vadd.f32 %v1579_v13, %v643_v45  ;;  %v699_v42 = vmax.f32 %v662_v36, 0.0 }
 0x13b   : > { %v692_v49 = vmax.f32 %v644_v47, 0.0  ;;  %1378 = vmatmul.msk.bf16.gmra.mxu2 %vm739_vm1, %v910_v46  ;;  %v717_v46 = vpack.c.bf16 %v700_v43, %v699_v42 }
 0x13c   : > { %v807_v50 = vpop.f32.mrf.mxu1 }
 0x13d   : > { %v713_v51 = vpack.c.bf16 %v692_v49, %v691_v48  ;;  %v808_v53 = vadd.f32 %v1636_v23, %v807_v50  ;;  %v667_v50 = vadd.f32 %v1579_v13, %v666_v41 }
 0x13f   : > { %1363 = vmatmul.msk.bf16.gmra.mxu1 %vm739_vm1, %v713_v51  ;;  %v881_v56 = vmax.f32 %v808_v53, 0.0  ;;  %v668_v47 = vpop.f32.mrf.mxu3 }
 0x140   : > { %v646_v52 = vpop.f32.mrf.mxu0  ;;  %v669_v51 = vadd.f32 %v1579_v13, %v668_v47 }
 0x141   : > { %v647_v57 = vadd.f32 %v1579_v13, %v646_v52 }
 0x143   : > { %v693_v62 = vmax.f32 %v647_v57, 0.0 }
 0x144   : > { %v809_v54 = vpop.f32.mrf.mxu1 }
 0x145   : > { %v810_v55 = vadd.f32 %v1636_v23, %v809_v54 }
 0x147   : > { %v882_v58 = vmax.f32 %v810_v55, 0.0  ;;  %v701_v55 = vmax.f32 %v667_v50, 0.0 }
 0x148   : > { %v648_v59 = vpop.f32.mrf.mxu0 }
 0x149   : > { %v911_v60 = vpack.c.bf16 %v882_v58, %v881_v56  ;;  %v649_v61 = vadd.f32 %v1579_v13, %v648_v59  ;;  %v702_v56 = vmax.f32 %v669_v51, 0.0 }
 0x14b   : > { %v694_v63 = vmax.f32 %v649_v61, 0.0  ;;  %1379 = vmatmul.msk.bf16.gmra.mxu2 %vm739_vm1, %v911_v60  ;;  %v718_v59 = vpack.c.bf16 %v702_v56, %v701_v55 }
 0x14c   : > { %v812_v0 = vpop.f32.mrf.mxu1 }
 0x14d   : > { %v714_v1 = vpack.c.bf16 %v694_v63, %v693_v62  ;;  %v813_v4 = vadd.f32 %v1636_v23, %v812_v0 }
 0x14f   : > { %1364 = vmatmul.msk.bf16.gmra.mxu1 %vm739_vm1, %v714_v1  ;;  %v883_v7 = vmax.f32 %v813_v4, 0.0 }
 0x150   : > { %v651_v2 = vpop.f32.mrf.mxu0 }
 0x151   : > { %v652_v8 = vadd.f32 %v1579_v13, %v651_v2 }
 0x153   : > { %v695_v15 = vmax.f32 %v652_v8, 0.0  ;;  %v1697_v8 = vld [vmem:[%s399_s15] ss:$0 sm:$0xff] }
 0x154   : > { %v814_v5 = vpop.f32.mrf.mxu1 }
 0x155   : > { %v815_v6 = vadd.f32 %v1636_v23, %v814_v5 }
 0x157   : > { %v884_v9 = vmax.f32 %v815_v6, 0.0 }
 0x158   : > { %v653_v10 = vpop.f32.mrf.mxu0 }
 0x159   : > { %v912_v11 = vpack.c.bf16 %v884_v9, %v883_v7  ;;  %v654_v12 = vadd.f32 %v1579_v13, %v653_v10 }
 0x15b   : > { %v696_v16 = vmax.f32 %v654_v12, 0.0  ;;  %1380 = vmatmul.msk.bf16.gmra.mxu2 %vm739_vm1, %v912_v11 }
 0x15c   : > { %v817_v17 = vpop.f32.mrf.mxu1 }
 0x15d   : > { %v715_v18 = vpack.c.bf16 %v696_v16, %v695_v15  ;;  %v818_v19 = vadd.f32 %v1636_v23, %v817_v17 }
 0x15f   : > { %1365 = vmatmul.msk.bf16.vlgmr.msrb.gmra.mxu3 %vm739_vm1, %v715_v18  ;;  %v885_v26 = vmax.f32 %v818_v19, 0.0 }
 0x164   : > { %v819_v20 = vpop.f32.mrf.mxu1 }
 0x165   : > { %v820_v25 = vadd.f32 %v1636_v23, %v819_v20 }
 0x167   : > { %v886_v27 = vmax.f32 %v820_v25, 0.0 }
 0x169   : > { %v913_v30 = vpack.c.bf16 %v886_v27, %v885_v26 }
 0x16b   : > { %1381 = vmatmul.msk.bf16.gmra.mxu2 %vm739_vm1, %v913_v30 }
 0x16c   : > { %v822_v31 = vpop.f32.mrf.mxu1 }
 0x16d   : > { %v823_v34 = vadd.f32 %v1636_v23, %v822_v31 }
 0x16f   : > { %1366 = vmatmul.msk.bf16.gmra.mxu3 %vm739_vm1, %v716_v32  ;;  %v887_v39 = vmax.f32 %v823_v34, 0.0 }
 0x174   : > { %v824_v35 = vpop.f32.mrf.mxu1 }
 0x175   : > { %v825_v38 = vadd.f32 %v1636_v23, %v824_v35 }
 0x177   : > { %v888_v40 = vmax.f32 %v825_v38, 0.0 }
 0x179   : > { %v914_v44 = vpack.c.bf16 %v888_v40, %v887_v39 }
 0x17b   : > { %1382 = vmatmul.msk.bf16.gmra.mxu2 %vm739_vm1, %v914_v44 }
 0x17c   : > { %v827_v45 = vpop.f32.mrf.mxu1 }
 0x17d   : > { %v828_v48 = vadd.f32 %v1636_v23, %v827_v45 }
 0x17f   : > { %1367 = vmatmul.msk.bf16.gmra.mxu3 %vm739_vm1, %v717_v46  ;;  %v889_v53 = vmax.f32 %v828_v48, 0.0 }
 0x184   : > { %v829_v49 = vpop.f32.mrf.mxu1 }
 0x185   : > { %v830_v52 = vadd.f32 %v1636_v23, %v829_v49 }
 0x187   : > { %v890_v54 = vmax.f32 %v830_v52, 0.0 }
 0x189   : > { %v915_v57 = vpack.c.bf16 %v890_v54, %v889_v53 }
 0x18b   : > { %1383 = vmatmul.msk.bf16.gmra.mxu2 %vm739_vm1, %v915_v57 }
 0x18c   : > { %v832_v58 = vpop.f32.mrf.mxu1 }
 0x18d   : > { %v833_v60 = vadd.f32 %v1636_v23, %v832_v58 }
 0x18f   : > { %1368 = vmatmul.msk.bf16.gmra.mxu3 %vm739_vm1, %v718_v59  ;;  %v891_v62 = vmax.f32 %v833_v60, 0.0 }
 0x194   : > { %v834_v61 = vpop.f32.mrf.mxu1 }
 0x195   : > { %v835_v13 = vadd.f32 %v1636_v23, %v834_v61 }
 0x197   : > { %v892_v63 = vmax.f32 %v835_v13, 0.0 }
 0x199   : > { %v916_v0 = vpack.c.bf16 %v892_v63, %v891_v62 }
 0x19b   : > { %1384 = vmatmul.msk.bf16.gmra.mxu2 %vm739_vm1, %v916_v0 }
 0x19c   : > { %v837_v1 = vpop.f32.mrf.mxu1 }
 0x19d   : > { %v838_v2 = vadd.f32 %v1636_v23, %v837_v1 }
 0x19f   : > { %v893_v5 = vmax.f32 %v838_v2, 0.0 }
 0x1a4   : > { %v839_v3 = vpop.f32.mrf.mxu1 }
 0x1a5   : > { %v840_v4 = vadd.f32 %v1636_v23, %v839_v3 }
 0x1a7   : > { %v894_v6 = vmax.f32 %v840_v4, 0.0 }
 0x1a9   : > { %v917_v7 = vpack.c.bf16 %v894_v6, %v893_v5 }
 0x1ab   : > { %1385 = vmatmul.msk.bf16.gmra.mxu2 %vm739_vm1, %v917_v7 }
 0x1ac   : > { %v842_v9 = vpop.f32.mrf.mxu1 }
 0x1ad   : > { %v843_v12 = vadd.f32 %v1636_v23, %v842_v9 }
 0x1ae   : > { %v1002_v10 = vpop.f32.mrf.mxu2 }
 0x1af   : > { %v1003_v11 = vadd.f32 %v1697_v8, %v1002_v10  ;;  %v895_v17 = vmax.f32 %v843_v12, 0.0 }
 0x1b1   : > { %1083 = vst.msk [vmem:[%s1702_s21] sm:$0xff] %vm1082_vm2, %v1003_v11 }
 0x1b4   : > { %v844_v14 = vpop.f32.mrf.mxu1 }
 0x1b5   : > { %v845_v15 = vadd.f32 %v1636_v23, %v844_v14 }
 0x1b6   : > { %v1004_v16 = vpop.f32.mrf.mxu2 }
 0x1b7   : > { %v896_v18 = vmax.f32 %v845_v15, 0.0  ;;  %v1005_v19 = vadd.f32 %v1697_v8, %v1004_v16 }
 0x1b9   : > { %v918_v20 = vpack.c.bf16 %v896_v18, %v895_v17  ;;  %1084 = vst.msk [vmem:[%s1702_s21 + $0x8] sm:$0xff] %vm1082_vm2, %v1005_v19 }
 0x1bb   : > { %1386 = vmatmul.msk.bf16.gmra.mxu2 %vm739_vm1, %v918_v20 }
 0x1bc   : > { %v847_v21 = vpop.f32.mrf.mxu1 }
 0x1bd   : > { %v848_v25 = vadd.f32 %v1636_v23, %v847_v21 }
 0x1be   : > { %v1007_v22 = vpop.f32.mrf.mxu2 }
 0x1bf   : > { %v1008_v24 = vadd.f32 %v1697_v8, %v1007_v22  ;;  %v897_v29 = vmax.f32 %v848_v25, 0.0 }
 0x1c1   : > { %1085 = vst.msk [vmem:[%s1702_s21 + $0x10] sm:$0xff] %vm1082_vm2, %v1008_v24 }
 0x1c4   : > { %v849_v26 = vpop.f32.mrf.mxu1 }
 0x1c5   : > { %v850_v27 = vadd.f32 %v1636_v23, %v849_v26 }
 0x1c6   : > { %v1009_v28 = vpop.f32.mrf.mxu2 }
 0x1c7   : > { %v898_v30 = vmax.f32 %v850_v27, 0.0  ;;  %v1010_v31 = vadd.f32 %v1697_v8, %v1009_v28 }
 0x1c9   : > { %v919_v32 = vpack.c.bf16 %v898_v30, %v897_v29  ;;  %1086 = vst.msk [vmem:[%s1702_s21 + $0x18] sm:$0xff] %vm1082_vm2, %v1010_v31 }
 0x1cb   : > { %1387 = vmatmul.msk.bf16.gmra.mxu2 %vm739_vm1, %v919_v32 }
 0x1cc   : > { %v852_v33 = vpop.f32.mrf.mxu1 }
 0x1cd   : > { %v853_v36 = vadd.f32 %v1636_v23, %v852_v33 }
 0x1ce   : > { %v1012_v34 = vpop.f32.mrf.mxu2 }
 0x1cf   : > { %v1013_v35 = vadd.f32 %v1697_v8, %v1012_v34  ;;  %v899_v40 = vmax.f32 %v853_v36, 0.0 }
 0x1d1   : > { %1087 = vst.msk [vmem:[%s1702_s21 + $0x20] sm:$0xff] %vm1082_vm2, %v1013_v35 }
 0x1d4   : > { %v854_v37 = vpop.f32.mrf.mxu1 }
 0x1d5   : > { %v855_v38 = vadd.f32 %v1636_v23, %v854_v37 }
 0x1d6   : > { %v1014_v39 = vpop.f32.mrf.mxu2 }
 0x1d7   : > { %v900_v41 = vmax.f32 %v855_v38, 0.0  ;;  %v1015_v42 = vadd.f32 %v1697_v8, %v1014_v39 }
 0x1d9   : > { %v920_v43 = vpack.c.bf16 %v900_v41, %v899_v40  ;;  %1088 = vst.msk [vmem:[%s1702_s21 + $0x28] sm:$0xff] %vm1082_vm2, %v1015_v42 }
 0x1db   : > { %1388 = vmatmul.msk.bf16.gmra.mxu2 %vm739_vm1, %v920_v43 }
 0x1de   : > { %v1017_v44 = vpop.f32.mrf.mxu2 }
 0x1df   : > { %v1018_v45 = vadd.f32 %v1697_v8, %v1017_v44 }
 0x1e1   : > { %1089 = vst.msk [vmem:[%s1702_s21 + $0x30] sm:$0xff] %vm1082_vm2, %v1018_v45 }
 0x1e2   : > { %v857_v46 = vpop.f32.mrf.mxu3 }
 0x1e3   : > { %v858_v49 = vadd.f32 %v1636_v23, %v857_v46 }
 0x1e5   : > { %v901_v52 = vmax.f32 %v858_v49, 0.0 }
 0x1e6   : > { %v1019_v47 = vpop.f32.mrf.mxu2 }
 0x1e7   : > { %v1020_v48 = vadd.f32 %v1697_v8, %v1019_v47 }
 0x1e9   : > { %1090 = vst.msk [vmem:[%s1702_s21 + $0x38] sm:$0xff] %vm1082_vm2, %v1020_v48 }
 0x1ea   : > { %v859_v50 = vpop.f32.mrf.mxu3 }
 0x1eb   : > { %v860_v51 = vadd.f32 %v1636_v23, %v859_v50 }
 0x1ed   : > { %v902_v53 = vmax.f32 %v860_v51, 0.0 }
 0x1ee   : > { %v1022_v54 = vpop.f32.mrf.mxu2 }
 0x1ef   : > { %v921_v55 = vpack.c.bf16 %v902_v53, %v901_v52  ;;  %v1023_v56 = vadd.f32 %v1697_v8, %v1022_v54 }
 0x1f1   : > { %1091 = vst.msk [vmem:[%s1702_s21 + $0x40] sm:$0xff] %vm1082_vm2, %v1023_v56  ;;  %1389 = vmatmul.msk.bf16.vlgmr.msra.gmra.mxu3 %vm739_vm1, %v921_v55 }
 0x1f2   : > { %v862_v57 = vpop.f32.mrf.mxu3 }
 0x1f3   : > { %v863_v60 = vadd.f32 %v1636_v23, %v862_v57 }
 0x1f5   : > { %v903_v62 = vmax.f32 %v863_v60, 0.0 }
 0x1f6   : > { %v1024_v58 = vpop.f32.mrf.mxu2 }
 0x1f7   : > { %v1025_v59 = vadd.f32 %v1697_v8, %v1024_v58 }
 0x1f9   : > { %1092 = vst.msk [vmem:[%s1702_s21 + $0x48] sm:$0xff] %vm1082_vm2, %v1025_v59 }
 0x1fa   : > { %v864_v61 = vpop.f32.mrf.mxu3 }
 0x1fb   : > { %v865_v13 = vadd.f32 %v1636_v23, %v864_v61 }
 0x1fd   : > { %v904_v63 = vmax.f32 %v865_v13, 0.0 }
 0x1fe   : > { %v1027_v0 = vpop.f32.mrf.mxu2 }
 0x1ff   : > { %v922_v1 = vpack.c.bf16 %v904_v63, %v903_v62  ;;  %v1028_v2 = vadd.f32 %v1697_v8, %v1027_v0 }
 0x201   : > { %1093 = vst.msk [vmem:[%s1702_s21 + $0x50] sm:$0xff] %vm1082_vm2, %v1028_v2  ;;  %1390 = vmatmul.msk.bf16.gmra.mxu3 %vm739_vm1, %v922_v1 }
 0x202   : > { %v867_v3 = vpop.f32.mrf.mxu3 }
 0x203   : > { %v868_v6 = vadd.f32 %v1636_v23, %v867_v3 }
 0x205   : > { %v905_v10 = vmax.f32 %v868_v6, 0.0 }
 0x206   : > { %v1029_v4 = vpop.f32.mrf.mxu2 }
 0x207   : > { %v1030_v5 = vadd.f32 %v1697_v8, %v1029_v4 }
 0x209   : > { %1094 = vst.msk [vmem:[%s1702_s21 + $0x58] sm:$0xff] %vm1082_vm2, %v1030_v5 }
 0x20a   : > { %v869_v7 = vpop.f32.mrf.mxu3 }
 0x20b   : > { %v870_v9 = vadd.f32 %v1636_v23, %v869_v7 }
 0x20d   : > { %v906_v11 = vmax.f32 %v870_v9, 0.0 }
 0x20e   : > { %v1032_v12 = vpop.f32.mrf.mxu2 }
 0x20f   : > { %v923_v14 = vpack.c.bf16 %v906_v11, %v905_v10  ;;  %v1033_v15 = vadd.f32 %v1697_v8, %v1032_v12 }
 0x211   : > { %1095 = vst.msk [vmem:[%s1702_s21 + $0x60] sm:$0xff] %vm1082_vm2, %v1033_v15  ;;  %1391 = vmatmul.msk.bf16.gmra.mxu3 %vm739_vm1, %v923_v14 }
 0x212   : > { %v872_v16 = vpop.f32.mrf.mxu3 }
 0x213   : > { %v873_v19 = vadd.f32 %v1636_v23, %v872_v16 }
 0x215   : > { %v907_v22 = vmax.f32 %v873_v19, 0.0 }
 0x216   : > { %v1034_v17 = vpop.f32.mrf.mxu2 }
 0x217   : > { %v1035_v18 = vadd.f32 %v1697_v8, %v1034_v17 }
 0x219   : > { %1096 = vst.msk [vmem:[%s1702_s21 + $0x68] sm:$0xff] %vm1082_vm2, %v1035_v18 }
 0x21a   : > { %v874_v20 = vpop.f32.mrf.mxu3 }
 0x21b   : > { %v875_v21 = vadd.f32 %v1636_v23, %v874_v20 }
 0x21d   : > { %v908_v24 = vmax.f32 %v875_v21, 0.0 }
 0x21e   : > { %v1037_v25 = vpop.f32.mrf.mxu2 }
 0x21f   : > { %v924_v26 = vpack.c.bf16 %v908_v24, %v907_v22  ;;  %v1038_v27 = vadd.f32 %v1697_v8, %v1037_v25 }
 0x221   : > { %1097 = vst.msk [vmem:[%s1702_s21 + $0x70] sm:$0xff] %vm1082_vm2, %v1038_v27  ;;  %1392 = vmatmul.msk.bf16.gmra.mxu3 %vm739_vm1, %v924_v26 }
 0x226   : > { %v1039_v28 = vpop.f32.mrf.mxu2 }
 0x227   : > { %v1040_v29 = vadd.f32 %v1697_v8, %v1039_v28 }
 0x229   : > { %1098 = vst.msk [vmem:[%s1702_s21 + $0x78] sm:$0xff] %vm1082_vm2, %v1040_v29 }
 0x22e   : > { %v1042_v23 = vpop.f32.mrf.mxu2 }
 0x22f   : > { %v1043_v30 = vadd.f32 %v1697_v8, %v1042_v23 }
 0x231   : > { %1099 = vst.msk [vmem:[%s1702_s21 + $0x80] sm:$0xff] %vm1082_vm2, %v1043_v30 }
 0x236   : > { %v1044_v31 = vpop.f32.mrf.mxu2 }
 0x237   : > { %v1045_v32 = vadd.f32 %v1697_v8, %v1044_v31 }
 0x239   : > { %1100 = vst.msk [vmem:[%s1702_s21 + $0x88] sm:$0xff] %vm1082_vm2, %v1045_v32 }
 0x23e   : > { %v1047_v33 = vpop.f32.mrf.mxu2 }
 0x23f   : > { %v1048_v34 = vadd.f32 %v1697_v8, %v1047_v33 }
 0x241   : > { %1101 = vst.msk [vmem:[%s1702_s21 + $0x90] sm:$0xff] %vm1082_vm2, %v1048_v34 }
 0x246   : > { %v1049_v35 = vpop.f32.mrf.mxu2 }
 0x247   : > { %v1050_v36 = vadd.f32 %v1697_v8, %v1049_v35 }
 0x249   : > { %1102 = vst.msk [vmem:[%s1702_s21 + $0x98] sm:$0xff] %vm1082_vm2, %v1050_v36 }
 0x24e   : > { %v1052_v37 = vpop.f32.mrf.mxu2 }
 0x24f   : > { %v1053_v38 = vadd.f32 %v1697_v8, %v1052_v37 }
 0x251   : > { %1103 = vst.msk [vmem:[%s1702_s21 + $0xa0] sm:$0xff] %vm1082_vm2, %v1053_v38 }
 0x256   : > { %v1054_v39 = vpop.f32.mrf.mxu2 }
 0x257   : > { %v1055_v40 = vadd.f32 %v1697_v8, %v1054_v39 }
 0x259   : > { %1104 = vst.msk [vmem:[%s1702_s21 + $0xa8] sm:$0xff] %vm1082_vm2, %v1055_v40 }
 0x25e   : > { %v1057_v41 = vpop.f32.mrf.mxu2 }
 0x25f   : > { %v1058_v42 = vadd.f32 %v1697_v8, %v1057_v41 }
 0x261   : > { %1105 = vst.msk [vmem:[%s1702_s21 + $0xb0] sm:$0xff] %vm1082_vm2, %v1058_v42 }
 0x266   : > { %v1059_v43 = vpop.f32.mrf.mxu2 }
 0x267   : > { %v1060_v44 = vadd.f32 %v1697_v8, %v1059_v43 }
 0x269   : > { %1106 = vst.msk [vmem:[%s1702_s21 + $0xb8] sm:$0xff] %vm1082_vm2, %v1060_v44 }
 0x274   : > { %v1062_v45 = vpop.f32.mrf.mxu3 }
 0x275   : > { %v1063_v46 = vadd.f32 %v1697_v8, %v1062_v45 }
 0x277   : > { %1107 = vst.msk [vmem:[%s1702_s21 + $0xc0] sm:$0xff] %vm1082_vm2, %v1063_v46 }
 0x27c   : > { %v1064_v47 = vpop.f32.mrf.mxu3 }
 0x27d   : > { %v1065_v48 = vadd.f32 %v1697_v8, %v1064_v47 }
 0x27f   : > { %1108 = vst.msk [vmem:[%s1702_s21 + $0xc8] sm:$0xff] %vm1082_vm2, %v1065_v48 }
 0x284   : > { %v1067_v49 = vpop.f32.mrf.mxu3 }
 0x285   : > { %v1068_v50 = vadd.f32 %v1697_v8, %v1067_v49 }
 0x287   : > { %1109 = vst.msk [vmem:[%s1702_s21 + $0xd0] sm:$0xff] %vm1082_vm2, %v1068_v50 }
 0x28c   : > { %v1069_v51 = vpop.f32.mrf.mxu3 }
 0x28d   : > { %v1070_v52 = vadd.f32 %v1697_v8, %v1069_v51 }
 0x28f   : > { %1110 = vst.msk [vmem:[%s1702_s21 + $0xd8] sm:$0xff] %vm1082_vm2, %v1070_v52 }
 0x294   : > { %v1072_v53 = vpop.f32.mrf.mxu3 }
 0x295   : > { %v1073_v54 = vadd.f32 %v1697_v8, %v1072_v53 }
 0x297   : > { %1111 = vst.msk [vmem:[%s1702_s21 + $0xe0] sm:$0xff] %vm1082_vm2, %v1073_v54 }
 0x29c   : > { %v1074_v55 = vpop.f32.mrf.mxu3 }
 0x29d   : > { %v1075_v56 = vadd.f32 %v1697_v8, %v1074_v55 }
 0x29f   : > { %1112 = vst.msk [vmem:[%s1702_s21 + $0xe8] sm:$0xff] %vm1082_vm2, %v1075_v56 }
 0x2a4   : > { %v1077_v57 = vpop.f32.mrf.mxu3 }
 0x2a5   : > { %v1078_v58 = vadd.f32 %v1697_v8, %v1077_v57 }
 0x2a7   : > { %1113 = vst.msk [vmem:[%s1702_s21 + $0xf0] sm:$0xff] %vm1082_vm2, %v1078_v58 }
 0x2ac   : > { %v1079_v59 = vpop.f32.mrf.mxu3 }
 0x2ad   : > { %v1080_v60 = vadd.f32 %v1697_v8, %v1079_v59 }
 0x2af   : > { %1114 = vst.msk [vmem:[%s1702_s21 + $0xf8] sm:$0xff] %vm1082_vm2, %v1080_v60 }
 0x2b0 PF: > { %s17_s26 = sadd.s32 1, %s1473_s26   ;;  %s1838_s24 = smov %s1469_s25 }
 0x2b1   : > { %p14_p6 = scmp.ge.s32.totalorder %s17_s26, 4   ;;  %s1839_s25 = smov %s1841_s27 }
 0x2b3   :  { %16 = sbr.rel (!%p14_p6) target bundleno = 2 (0x2), region = 96 }

</bundles_post_ra>
